<compile_context>
chip_gen: v6e
topology: v6e:2x2x1
jax: 0.10.0
libtpu: 0.0.40
codegen_flags: <defaults>
</compile_context>

<pallas_src>
from functools import partial

import jax
import jax.numpy as jnp
from jax.experimental import pallas as pl
from jax.experimental.pallas import tpu as pltpu

LANE = 128


# ------------------------------- small helpers ------------------------------ #
def _round_up(x, m):
    return (x + m - 1) // m * m


def _default_vmem_limit():
    """Generation-aware VMEM budget: ~3/4 of physical, capped at 100 MiB."""
    cap = 64 << 20  # conservative default = v7x physical VMEM per TensorCore
    try:
        info = pltpu.get_tpu_info()
        cap = int(getattr(info, "vmem_capacity_bytes", cap) or cap)
    except Exception:
        pass
    return int(min(cap - cap // 4, 100 << 20))


def _pick_row_tile(n_pad, cap=512):
    """Row (sublane) tile: multiple of 8, divides n_pad, <= cap, and small
    enough that the grid has >= 2 row tiles (so both v7x TCs get work)."""
    target = min(cap, max(8, n_pad // 2))
    t = max(8, (target // 8) * 8)
    while n_pad % t:
        t -= 8
    return t


def _pick_k_tile(n_pad, cap=512):
    """K (lane) tile: multiple of 128, divides n_pad, <= cap."""
    t = max(LANE, (min(cap, n_pad) // LANE) * LANE)
    while n_pad % t:
        t -= LANE
    return t


# -------------------------------- Pallas kernels ---------------------------- #
def _gcn_fused_all_kernel(*refs, n_layers):
    """Entire GCN forward in one kernel; A_hat / H / all W,b resident in VMEM.

    refs = (a_ref, x_ref, w_0, b_0, ..., w_{L-1}, b_{L-1}, o_ref)
    """
    a_ref, x_ref, o_ref = refs[0], refs[1], refs[-1]
    a = a_ref[...]
    h = x_ref[...]
    for li in range(n_layers):
        w = refs[2 + 2 * li][...]
        b = refs[3 + 2 * li][...].astype(jnp.float32)
        f_in, f_out = w.shape
        if f_in <= f_out:           # aggregate first: (A @ H) @ W
            ah = jnp.dot(a, h, preferred_element_type=jnp.float32)
            z = jnp.dot(ah.astype(jnp.bfloat16), w,
                        preferred_element_type=jnp.float32) + b
        else:                       # transform first: A @ (H @ W)
            hw = jnp.dot(h, w, preferred_element_type=jnp.float32)
            z = jnp.dot(a, hw.astype(jnp.bfloat16),
                        preferred_element_type=jnp.float32) + b
        if li < n_layers - 1:
            h = jnp.maximum(z, 0.0).astype(jnp.bfloat16)
        else:
            h = z
    o_ref[...] = h.astype(o_ref.dtype)


def _gcn_layer_kernel(a_ref, x_ref, w_ref, b_ref, o_ref, acc_ref, *,
                      w_mode, x_resident, tk, apply_relu):
    """One GCN layer, tiled over (row tiles, k tiles); W transform fused.

    w_mode == "post": acc += A_ik @ X_k        ; epilogue: (acc @ W) + b
    w_mode == "pre" : acc += A_ik @ (X_k @ W)  ; epilogue:  acc + b
    """
    k = pl.program_id(1)

    @pl.when(k == 0)
    def _():
        acc_ref[...] = jnp.zeros_like(acc_ref)

    if x_resident:
        xk = x_ref[pl.ds(pl.multiple_of(k * tk, tk), tk), :]
    else:
        xk = x_ref[...]

    if w_mode == "pre":
        xk = jnp.dot(xk, w_ref[...],
                     preferred_element_type=jnp.float32).astype(jnp.bfloat16)

    acc_ref[...] += jnp.dot(a_ref[...], xk, preferred_element_type=jnp.float32)

    @pl.when(k == pl.num_programs(1) - 1)
    def _():
        if w_mode == "post":
            h = jnp.dot(acc_ref[...].astype(jnp.bfloat16), w_ref[...],
                        preferred_element_type=jnp.float32)
        else:
            h = acc_ref[...]
        h = h + b_ref[...].astype(jnp.float32)
        if apply_relu:
            h = jnp.maximum(h, 0.0)
        o_ref[...] = h.astype(o_ref.dtype)


# ------------------------------- kernel wrappers ---------------------------- #
def gcn_all_layers(a_hat, x, weights, biases, *, out_dtype, vmem_limit):
    """Whole network in a single pallas_call (small-graph fast path)."""
    n_pad = a_hat.shape[0]
    n_layers = len(weights)
    f_out_pad = weights[-1].shape[1]

    in_specs = [pl.BlockSpec(a_hat.shape, lambda i: (0, 0)),
                pl.BlockSpec(x.shape, lambda i: (0, 0))]
    args = [a_hat, x]
    for w, b in zip(weights, biases):
        in_specs.append(pl.BlockSpec(w.shape, lambda i: (0, 0)))
        in_specs.append(pl.BlockSpec(b.shape, lambda i: (0, 0)))
        args.extend([w, b])

    return pl.pallas_call(
        partial(_gcn_fused_all_kernel, n_layers=n_layers),
        out_shape=jax.ShapeDtypeStruct((n_pad, f_out_pad), out_dtype),
        grid=(1,),
        in_specs=in_specs,
        out_specs=pl.BlockSpec((n_pad, f_out_pad), lambda i: (0, 0)),
        compiler_params=pltpu.CompilerParams(vmem_limit_bytes=vmem_limit),
    )(*args)


def gcn_layer(a_hat, x, w, b, *, apply_relu, out_dtype, vmem_limit,
              x_resident=None):
    """One fused GCN layer:  act(A_hat @ X @ W + b), tiled over rows / K."""
    n_pad = a_hat.shape[0]
    f_in_pad, f_out_pad = w.shape
    tm = _pick_row_tile(n_pad)
    tk = _pick_k_tile(n_pad)

    w_mode = "post" if f_in_pad <= f_out_pad else "pre"
    acc_w = f_in_pad if w_mode == "post" else f_out_pad
    out_bytes = jnp.dtype(out_dtype).itemsize

    if x_resident is None:
        # VMEM estimate with X fully resident (double buffers counted pessimistically)
        est = (2 * tm * tk * 2                  # A_hat tiles (bf16)
               + 2 * n_pad * f_in_pad * 2       # resident X (bf16)
               + 2 * f_in_pad * f_out_pad * 2   # W (bf16)
               + 2 * tm * f_out_pad * out_bytes # output tiles
               + tm * acc_w * 4)                # f32 accumulator
        x_resident = est <= int(0.8 * vmem_limit)

    x_spec = (pl.BlockSpec((n_pad, f_in_pad), lambda i, k: (0, 0)) if x_resident
              else pl.BlockSpec((tk, f_in_pad), lambda i, k: (k, 0)))

    return pl.pallas_call(
        partial(_gcn_layer_kernel, w_mode=w_mode, x_resident=x_resident,
                tk=tk, apply_relu=apply_relu),
        out_shape=jax.ShapeDtypeStruct((n_pad, f_out_pad), out_dtype),
        grid=(n_pad // tm, n_pad // tk),
        in_specs=[
            pl.BlockSpec((tm, tk), lambda i, k: (i, k)),              # A_hat tile
            x_spec,                                                   # X
            pl.BlockSpec((f_in_pad, f_out_pad), lambda i, k: (0, 0)), # W (resident)
            pl.BlockSpec((1, f_out_pad), lambda i, k: (0, 0)),        # bias
        ],
        out_specs=pl.BlockSpec((tm, f_out_pad), lambda i, k: (i, 0)),
        scratch_shapes=[pltpu.VMEM((tm, acc_w), jnp.float32)],
        compiler_params=pltpu.CompilerParams(
            dimension_semantics=("parallel", "arbitrary"),
            vmem_limit_bytes=vmem_limit),
    )(a_hat, x, w, b)


# --------------------------------- glue (JAX) ------------------------------- #
def normalized_adjacency(edge_index, num_nodes, n_pad):
    """Dense D^{-1/2}(A+I)D^{-1/2}, zero-padded to (n_pad, n_pad), cast to bf16."""
    src, dst = edge_index[0], edge_index[1]
    a = jnp.zeros((num_nodes, num_nodes), jnp.float32)
    a = a.at[dst, src].add(1.0)                      # message flows src -> dst
    a = a + jnp.eye(num_nodes, dtype=jnp.float32)    # self loops
    deg = a.sum(axis=1)
    dinv = jnp.where(deg > 0, jax.lax.rsqrt(deg), 0.0)
    a = dinv[:, None] * a * dinv[None, :]
    a_pad = jnp.zeros((n_pad, n_pad), jnp.float32).at[:num_nodes, :num_nodes].set(a)
    # TODO(synk): on v5e/v6e an int8 A_hat (values in [0,1]) would halve the
    # dominant HBM stream; kept bf16 so the same code also runs on v7x (fp8-only MXU).
    # TODO(synk): for very large sparse graphs, replace dense A_hat with a
    # block-CSR layout driven by PrefetchScalarGridSpec instead of O(N^2) tiles.
    return a_pad.astype(jnp.bfloat16)


class GCNPallas:
    """Mirrors GCN(in_dim, hid_dim, out_dim, n_layers) from Ours/model_all.py."""

    def __init__(self, in_dim, hid_dim, out_dim, n_layers, key):
        self.n_layers = n_layers
        if n_layers == 1:
            dims = [in_dim, hid_dim]
        else:
            dims = [in_dim] + [hid_dim] * (n_layers - 1) + [out_dim]
        self.dims = dims
        self.dims_pad = [_round_up(d, LANE) for d in dims]
        self.vmem_limit = _default_vmem_limit()

        self.weights = []   # bf16, zero-padded to (F_in_pad, F_out_pad)
        self.biases = []    # f32,  zero-padded to (1, F_out_pad)
        for li in range(len(dims) - 1):
            key, wk = jax.random.split(key)
            fan_in, fan_out = dims[li], dims[li + 1]
            scale = jnp.sqrt(6.0 / (fan_in + fan_out))        # glorot uniform
            w = jax.random.uniform(wk, (fan_in, fan_out), jnp.float32,
                                   minval=-scale, maxval=scale)
            w_pad = jnp.zeros((self.dims_pad[li], self.dims_pad[li + 1]),
                              jnp.float32).at[:fan_in, :fan_out].set(w)
            self.weights.append(w_pad.astype(jnp.bfloat16))
            self.biases.append(jnp.zeros((1, self.dims_pad[li + 1]), jnp.float32))

    def _fused_all_fits(self, n_pad):
        f_max = max(self.dims_pad)
        est = 2 * n_pad * n_pad * 2                       # A_hat (pessimistic 2x)
        est += 2 * n_pad * self.dims_pad[0] * 2           # X
        est += 2 * n_pad * self.dims_pad[-1] * 4          # f32 output
        est += sum(2 * w.size * 2 for w in self.weights)  # weights
        est += 4 * n_pad * f_max * 4                      # in-kernel temporaries
        return est <= int(0.7 * self.vmem_limit)

    def __call__(self, x, edge_index, *, force_tiled=False):
        n = x.shape[0]
        n_pad = _round_up(max(n, LANE), LANE)
        # A_hat rebuilt every call (previous id()-keyed cache could go stale).
        a_hat = normalized_adjacency(edge_index, n, n_pad)

        h = jnp.zeros((n_pad, self.dims_pad[0]), jnp.bfloat16)
        h = h.at[:n, :self.dims[0]].set(x.astype(jnp.bfloat16))

        if not force_tiled and self._fused_all_fits(n_pad):
            out = gcn_all_layers(a_hat, h, self.weights, self.biases,
                                 out_dtype=jnp.float32,
                                 vmem_limit=self.vmem_limit)
        else:
            n_conv = len(self.weights)
            out = h
            for i in range(n_conv):
                last = (i == n_conv - 1)
                out = gcn_layer(a_hat, out, self.weights[i], self.biases[i],
                                apply_relu=not last,
                                out_dtype=jnp.float32 if last else jnp.bfloat16,
                                vmem_limit=self.vmem_limit)
        # slice off node / feature padding
        return out[:n, :self.dims[-1]]


# ------------------------------------ main ---------------------------------- #
if __name__ == "__main__":
    key = jax.random.PRNGKey(0)
    k_x, k_e, k_p, k_t = jax.random.split(key, 4)

    num_nodes = 16
    in_dim, hid_dim, out_dim, n_layers = 8, 32, 16, 3
    num_edges = 40

    x = jax.random.normal(k_x, (num_nodes, in_dim), jnp.float32)
    edge_index = jax.random.randint(k_e, (2, num_edges), 0, num_nodes,
                                    dtype=jnp.int32)

    model = GCNPallas(in_dim, hid_dim, out_dim, n_layers, k_p)

    out_fused = model(x, edge_index)                    # whole-network fused path
    out_tiled = model(x, edge_index, force_tiled=True)  # per-layer tiled path
    jax.block_until_ready((out_fused, out_tiled))

    assert out_fused.shape == (num_nodes, out_dim)
    assert out_fused.dtype == jnp.float32
    assert bool(jnp.allclose(out_fused, out_tiled, rtol=2e-2, atol=2e-2))

    # Extra coverage: "pre" (transform-in-loop) + streamed-X + multi-k branch of
    # the per-layer kernel, checked against a jnp reference with matching dtypes.
    ka, kx2, kw2 = jax.random.split(k_t, 3)
    n_pad2, f_in2, f_out2 = 1024, 256, 128
    a2 = jax.random.uniform(ka, (n_pad2, n_pad2), jnp.float32).astype(jnp.bfloat16)
    x2 = jax.random.normal(kx2, (n_pad2, f_in2), jnp.float32).astype(jnp.bfloat16)
    w2 = (0.1 * jax.random.normal(kw2, (f_in2, f_out2), jnp.float32)).astype(jnp.bfloat16)
    b2 = jnp.zeros((1, f_out2), jnp.float32)
    y2 = gcn_layer(a2, x2, w2, b2, apply_relu=True, out_dtype=jnp.float32,
                   vmem_limit=_default_vmem_limit(), x_resident=False)
    hw2 = jnp.dot(x2, w2, preferred_element_type=jnp.float32).astype(jnp.bfloat16)
    ref2 = jnp.maximum(jnp.dot(a2, hw2, preferred_element_type=jnp.float32) + b2, 0.0)
    jax.block_until_ready(y2)
    assert bool(jnp.allclose(y2, ref2, rtol=2e-2, atol=2e-2))

    print("KERNEL_OK")
</pallas_src>

<mosaic_0001>
module attributes {stable_mosaic.version = 11 : i64} {
  func.func @_gcn_fused_all_kernel(%arg0: i32, %arg1: memref<128x128xbf16, #tpu.memory_space<vmem>>, %arg2: memref<128x128xbf16, #tpu.memory_space<vmem>>, %arg3: memref<128x128xbf16, #tpu.memory_space<vmem>>, %arg4: memref<1x128xf32, #tpu.memory_space<vmem>>, %arg5: memref<128x128xbf16, #tpu.memory_space<vmem>>, %arg6: memref<1x128xf32, #tpu.memory_space<vmem>>, %arg7: memref<128x128xbf16, #tpu.memory_space<vmem>>, %arg8: memref<1x128xf32, #tpu.memory_space<vmem>>, %arg9: memref<128x128xf32, #tpu.memory_space<vmem>>) attributes {dimension_semantics = [#tpu.dimension_semantics<arbitrary>], iteration_bounds = array<i64: 1>, scalar_prefetch = 0 : i64, scratch_operands = 0 : i64, tpu.core_type = #tpu.core_type<tc>, window_params = [{pipeline_mode = #tpu.pipeline_mode<synchronous>, transform_indices = @transform_0, window_bounds = array<i64: 128, 128>}, {pipeline_mode = #tpu.pipeline_mode<synchronous>, transform_indices = @transform_1, window_bounds = array<i64: 128, 128>}, {pipeline_mode = #tpu.pipeline_mode<synchronous>, transform_indices = @transform_2, window_bounds = array<i64: 128, 128>}, {pipeline_mode = #tpu.pipeline_mode<synchronous>, transform_indices = @transform_3, window_bounds = array<i64: 1, 128>}, {pipeline_mode = #tpu.pipeline_mode<synchronous>, transform_indices = @transform_4, window_bounds = array<i64: 128, 128>}, {pipeline_mode = #tpu.pipeline_mode<synchronous>, transform_indices = @transform_5, window_bounds = array<i64: 1, 128>}, {pipeline_mode = #tpu.pipeline_mode<synchronous>, transform_indices = @transform_6, window_bounds = array<i64: 128, 128>}, {pipeline_mode = #tpu.pipeline_mode<synchronous>, transform_indices = @transform_7, window_bounds = array<i64: 1, 128>}, {pipeline_mode = #tpu.pipeline_mode<synchronous>, transform_indices = @transform_8, window_bounds = array<i64: 128, 128>}]} {
    %c0 = arith.constant 0 : index
    %c0_0 = arith.constant 0 : index
    %0 = vector.load %arg1[%c0, %c0_0] : memref<128x128xbf16, #tpu.memory_space<vmem>>, vector<128x128xbf16>
    %c0_1 = arith.constant 0 : index
    %c0_2 = arith.constant 0 : index
    %1 = vector.load %arg2[%c0_1, %c0_2] : memref<128x128xbf16, #tpu.memory_space<vmem>>, vector<128x128xbf16>
    %c0_3 = arith.constant 0 : index
    %c0_4 = arith.constant 0 : index
    %2 = vector.load %arg3[%c0_3, %c0_4] : memref<128x128xbf16, #tpu.memory_space<vmem>>, vector<128x128xbf16>
    %c0_5 = arith.constant 0 : index
    %c0_6 = arith.constant 0 : index
    %3 = vector.load %arg4[%c0_5, %c0_6] : memref<1x128xf32, #tpu.memory_space<vmem>>, vector<1x128xf32>
    %cst = arith.constant dense<0.000000e+00> : vector<128x128xf32>
    %4 = tpu.matmul %0, %1, %cst {dimension_numbers = #tpu.dot_dimension_numbers<[1], [0], [0], [1], [0, 0, 1, 1], [], []>} : vector<128x128xbf16>, vector<128x128xbf16>, vector<128x128xf32> -> vector<128x128xf32>
    %5 = arith.truncf %4 : vector<128x128xf32> to vector<128x128xbf16>
    %cst_7 = arith.constant dense<0.000000e+00> : vector<128x128xf32>
    %6 = tpu.matmul %5, %2, %cst_7 {dimension_numbers = #tpu.dot_dimension_numbers<[1], [0], [0], [1], [0, 0, 1, 1], [], []>} : vector<128x128xbf16>, vector<128x128xbf16>, vector<128x128xf32> -> vector<128x128xf32>
    %7 = vector.broadcast %3 : vector<1x128xf32> to vector<128x128xf32>
    %8 = arith.addf %6, %7 : vector<128x128xf32>
    %cst_8 = arith.constant 0.000000e+00 : f32
    %9 = vector.broadcast %cst_8 : f32 to vector<128x128xf32>
    %10 = arith.maximumf %8, %9 : vector<128x128xf32>
    %11 = arith.truncf %10 : vector<128x128xf32> to vector<128x128xbf16>
    %c0_9 = arith.constant 0 : index
    %c0_10 = arith.constant 0 : index
    %12 = vector.load %arg5[%c0_9, %c0_10] : memref<128x128xbf16, #tpu.memory_space<vmem>>, vector<128x128xbf16>
    %c0_11 = arith.constant 0 : index
    %c0_12 = arith.constant 0 : index
    %13 = vector.load %arg6[%c0_11, %c0_12] : memref<1x128xf32, #tpu.memory_space<vmem>>, vector<1x128xf32>
    %cst_13 = arith.constant dense<0.000000e+00> : vector<128x128xf32>
    %14 = tpu.matmul %0, %11, %cst_13 {dimension_numbers = #tpu.dot_dimension_numbers<[1], [0], [0], [1], [0, 0, 1, 1], [], []>} : vector<128x128xbf16>, vector<128x128xbf16>, vector<128x128xf32> -> vector<128x128xf32>
    %15 = arith.truncf %14 : vector<128x128xf32> to vector<128x128xbf16>
    %cst_14 = arith.constant dense<0.000000e+00> : vector<128x128xf32>
    %16 = tpu.matmul %15, %12, %cst_14 {dimension_numbers = #tpu.dot_dimension_numbers<[1], [0], [0], [1], [0, 0, 1, 1], [], []>} : vector<128x128xbf16>, vector<128x128xbf16>, vector<128x128xf32> -> vector<128x128xf32>
    %17 = vector.broadcast %13 : vector<1x128xf32> to vector<128x128xf32>
    %18 = arith.addf %16, %17 : vector<128x128xf32>
    %cst_15 = arith.constant 0.000000e+00 : f32
    %19 = vector.broadcast %cst_15 : f32 to vector<128x128xf32>
    %20 = arith.maximumf %18, %19 : vector<128x128xf32>
    %21 = arith.truncf %20 : vector<128x128xf32> to vector<128x128xbf16>
    %c0_16 = arith.constant 0 : index
    %c0_17 = arith.constant 0 : index
    %22 = vector.load %arg7[%c0_16, %c0_17] : memref<128x128xbf16, #tpu.memory_space<vmem>>, vector<128x128xbf16>
    %c0_18 = arith.constant 0 : index
    %c0_19 = arith.constant 0 : index
    %23 = vector.load %arg8[%c0_18, %c0_19] : memref<1x128xf32, #tpu.memory_space<vmem>>, vector<1x128xf32>
    %cst_20 = arith.constant dense<0.000000e+00> : vector<128x128xf32>
    %24 = tpu.matmul %0, %21, %cst_20 {dimension_numbers = #tpu.dot_dimension_numbers<[1], [0], [0], [1], [0, 0, 1, 1], [], []>} : vector<128x128xbf16>, vector<128x128xbf16>, vector<128x128xf32> -> vector<128x128xf32>
    %25 = arith.truncf %24 : vector<128x128xf32> to vector<128x128xbf16>
    %cst_21 = arith.constant dense<0.000000e+00> : vector<128x128xf32>
    %26 = tpu.matmul %25, %22, %cst_21 {dimension_numbers = #tpu.dot_dimension_numbers<[1], [0], [0], [1], [0, 0, 1, 1], [], []>} : vector<128x128xbf16>, vector<128x128xbf16>, vector<128x128xf32> -> vector<128x128xf32>
    %27 = vector.broadcast %23 : vector<1x128xf32> to vector<128x128xf32>
    %28 = arith.addf %26, %27 : vector<128x128xf32>
    %c0_22 = arith.constant 0 : index
    %c0_23 = arith.constant 0 : index
    %29 = vector.load %arg9[%c0_22, %c0_23] : memref<128x128xf32, #tpu.memory_space<vmem>>, vector<128x128xf32>
    tpu.vector_store %arg9[%c0_22, %c0_23], %28 {strides = array<i32>} : memref<128x128xf32, #tpu.memory_space<vmem>>, vector<128x128xf32>,
    return
  }
  func.func @transform_0(%arg0: i32) -> (i32, i32) {
    %c0_i32 = arith.constant 0 : i32
    %c0_i32_0 = arith.constant 0 : i32
    %c0_i32_1 = arith.constant 0 : i32
    return %c0_i32, %c0_i32_0 : i32, i32
  }
  func.func @transform_1(%arg0: i32) -> (i32, i32) {
    %c0_i32 = arith.constant 0 : i32
    %c0_i32_0 = arith.constant 0 : i32
    %c0_i32_1 = arith.constant 0 : i32
    return %c0_i32, %c0_i32_0 : i32, i32
  }
  func.func @transform_2(%arg0: i32) -> (i32, i32) {
    %c0_i32 = arith.constant 0 : i32
    %c0_i32_0 = arith.constant 0 : i32
    %c0_i32_1 = arith.constant 0 : i32
    return %c0_i32, %c0_i32_0 : i32, i32
  }
  func.func @transform_3(%arg0: i32) -> (i32, i32) {
    %c0_i32 = arith.constant 0 : i32
    %c0_i32_0 = arith.constant 0 : i32
    %c0_i32_1 = arith.constant 0 : i32
    return %c0_i32, %c0_i32_0 : i32, i32
  }
  func.func @transform_4(%arg0: i32) -> (i32, i32) {
    %c0_i32 = arith.constant 0 : i32
    %c0_i32_0 = arith.constant 0 : i32
    %c0_i32_1 = arith.constant 0 : i32
    return %c0_i32, %c0_i32_0 : i32, i32
  }
  func.func @transform_5(%arg0: i32) -> (i32, i32) {
    %c0_i32 = arith.constant 0 : i32
    %c0_i32_0 = arith.constant 0 : i32
    %c0_i32_1 = arith.constant 0 : i32
    return %c0_i32, %c0_i32_0 : i32, i32
  }
  func.func @transform_6(%arg0: i32) -> (i32, i32) {
    %c0_i32 = arith.constant 0 : i32
    %c0_i32_0 = arith.constant 0 : i32
    %c0_i32_1 = arith.constant 0 : i32
    return %c0_i32, %c0_i32_0 : i32, i32
  }
  func.func @transform_7(%arg0: i32) -> (i32, i32) {
    %c0_i32 = arith.constant 0 : i32
    %c0_i32_0 = arith.constant 0 : i32
    %c0_i32_1 = arith.constant 0 : i32
    return %c0_i32, %c0_i32_0 : i32, i32
  }
  func.func @transform_8(%arg0: i32) -> (i32, i32) {
    %c0_i32 = arith.constant 0 : i32
    %c0_i32_0 = arith.constant 0 : i32
    %c0_i32_1 = arith.constant 0 : i32
    return %c0_i32, %c0_i32_0 : i32, i32
  }
}

</mosaic_0001>

<bundles_post_ra>
// kernel: tpu_custom_call.1
= control target key start
LH: loop header
LB: loop body
LE: loop exit
PB: predicated region body
PF: predicated region fallthrough
CT: control target
= control target key end

     0   :  { %13 = vsyncpa [#allocation3], 0  ;;  %s1775_s0 = inlined_call_operand.hbm [shape: bf16[128,128], index: 0, kind: input, shape index: {}]   ;;  %s1776_s1 = inlined_call_operand.hbm [shape: bf16[128,128], index: 1, kind: input, shape index: {}]   ;;  %s1777_s2 = inlined_call_operand.hbm [shape: bf16[128,128], index: 2, kind: input, shape index: {}]   ;;  %s1778_s3 = inlined_call_operand.vmem [shape: f32[1,128], index: 3, kind: input, shape index: {}]   ;;  %s1779_s4 = inlined_call_operand.hbm [shape: bf16[128,128], index: 4, kind: input, shape index: {}]   ;;  %s1780_s5 = inlined_call_operand.vmem [shape: f32[1,128], index: 5, kind: input, shape index: {}]   ;;  %s1781_s6 = inlined_call_operand.hbm [shape: bf16[128,128], index: 6, kind: input, shape index: {}]   ;;  %s1782_s7 = inlined_call_operand.vmem [shape: f32[1,128], index: 7, kind: input, shape index: {}]   ;;  %s1783_s8 = inlined_call_operand.hbm [shape: f32[128,128], index: 8, kind: output, shape index: {}]  }
   0x1   :  { %14 = vsyncpa [#allocation6], 0 }
   0x2   :  { %15 = vsyncpa [#allocation9], 0 }
   0x3   :  { %16 = vsyncpa [#allocation4], 0  ;;  %s1638_s27 = smov [#allocation5]   ;;  %s1639_s29 = smov [#allocation8]  }
   0x4   :  { %s34_s28 = sshll.u32 %s1638_s27, 4  ;;  %s60_s30 = sshll.u32 %s1639_s29, 4  ;;  %s35_s28 = int_to_ptr.vmem [resolvable:$true] %s34_s28  ;;  %s61_s30 = int_to_ptr.vmem [resolvable:$true] %s60_s30 }
   0x5   :  { %s1518_s9 = scalar_lea.vmem %s35_s28, 1024  ;;  %p1523_p1 = scmp.lt.s32.totalorder %s35_s28, %s35_s28 }
   0x6   :  { %p1519_p0 = scmp.ne.s32.totalorder %s35_s28, %s1518_s9  ;;  %p1524_p2 = scmp.lt.s32.totalorder %s1518_s9, %s1518_s9 }
   0x8   :  { %p1525_p3 = por %p1524_p2, %p1523_p1 }
   0xa   :  { %p1526_p4 = pnand %p1525_p3, %p1519_p0 }
   0xc   :  { %1529 = shalt.err (!%p1526_p4)
}
   0xd   :  { %s1640_s10 = smov 64   ;;  %s1641_s11 = smov 4  }
   0xe   :  { %40 = dma.hbm_to_vmem [thread:$0]  %s1776_s1, 1024, %s35_s28, [#allocation6], %s1640_s10, %s1640_s10, %s1641_s11  }
   0xf   :  { %s1538_s14 = scalar_lea.vmem %s61_s30, 1024  ;;  %p1543_p6 = scmp.lt.s32.totalorder %s61_s30, %s61_s30 }
  0x10   :  { %p1539_p5 = scmp.ne.s32.totalorder %s61_s30, %s1538_s14  ;;  %p1544_p7 = scmp.lt.s32.totalorder %s1538_s14, %s1538_s14 }
  0x12   :  { %p1545_p8 = por %p1544_p7, %p1543_p6 }
  0x14   :  { %p1546_p9 = pnand %p1545_p8, %p1539_p5 }
  0x16   :  { %1549 = shalt.err (!%p1546_p9)
}
  0x17   :  { %66 = dma.hbm_to_vmem [thread:$0]  %s1779_s4, 1024, %s61_s30, [#allocation9], %s1640_s10, %s1640_s10, %s1641_s11  }
  0x18   :  { %s1642_s17 = smov [#allocation2]   ;;  %s1643_s19 = smov [#allocation7]  }
  0x19   :  { %s22_s18 = sshll.u32 %s1642_s17, 4  ;;  %s46_s20 = sshll.u32 %s1643_s19, 4  ;;  %s23_s18 = int_to_ptr.vmem [resolvable:$true] %s22_s18  ;;  %s47_s20 = int_to_ptr.vmem [resolvable:$true] %s46_s20 }
  0x1a   :  { %s1558_s1 = scalar_lea.vmem %s23_s18, 1024  ;;  %p1563_p11 = scmp.lt.s32.totalorder %s23_s18, %s23_s18 }
  0x1b   :  { %p1559_p10 = scmp.ne.s32.totalorder %s23_s18, %s1558_s1  ;;  %p1564_p12 = scmp.lt.s32.totalorder %s1558_s1, %s1558_s1 }
  0x1d   :  { %p1565_p13 = por %p1564_p12, %p1563_p11 }
  0x1f   :  { %p1566_p0 = pnand %p1565_p13, %p1559_p10 }
  0x21   :  { %1569 = shalt.err (!%p1566_p0)
}
  0x22   :  { %28 = dma.hbm_to_vmem [thread:$0]  %s1775_s0, 1024, %s23_s18, [#allocation3], %s1640_s10, %s1640_s10, %s1641_s11  }
  0x23   :  { %s1578_s4 = scalar_lea.vmem %s47_s20, 1024  ;;  %p1583_p2 = scmp.lt.s32.totalorder %s47_s20, %s47_s20 }
  0x24   :  { %p1579_p1 = scmp.ne.s32.totalorder %s47_s20, %s1578_s4  ;;  %p1584_p3 = scmp.lt.s32.totalorder %s1578_s4, %s1578_s4 }
  0x26   :  { %p1585_p4 = por %p1584_p3, %p1583_p2 }
  0x28   :  { %p1586_p5 = pnand %p1585_p4, %p1579_p1 }
  0x2a   :  { %1589 = shalt.err (!%p1586_p5)
}
  0x2b   :  { %52 = dma.hbm_to_vmem [thread:$0]  %s1777_s2, 1024, %s47_s20, [#allocation6], %s1640_s10, %s1640_s10, %s1641_s11  }
  0x2c   :  { %s1644_s25 = smov [#allocation10]  }
  0x2d   :  { %s74_s26 = sshll.u32 %s1644_s25, 4  ;;  %s75_s26 = int_to_ptr.vmem [resolvable:$true] %s74_s26 }
  0x2e   :  { %s1598_s27 = scalar_lea.vmem %s75_s26, 1024  ;;  %p1603_p7 = scmp.lt.s32.totalorder %s75_s26, %s75_s26 }
  0x2f   :  { %p1599_p6 = scmp.ne.s32.totalorder %s75_s26, %s1598_s27  ;;  %p1604_p8 = scmp.lt.s32.totalorder %s1598_s27, %s1598_s27 }
  0x31   :  { %p1605_p9 = por %p1604_p8, %p1603_p7 }
  0x33   :  { %p1606_p10 = pnand %p1605_p9, %p1599_p6 }
  0x35   :  { %1609 = shalt.err (!%p1606_p10)
}
  0x36   :  { %80 = dma.hbm_to_vmem [thread:$0]  %s1781_s6, 1024, %s75_s26, [#allocation9], %s1640_s10, %s1640_s10, %s1641_s11  }
  0x37   :  { %1630 = dma.done.wait [#allocation3], 1024  }
  0x38   :  { %1631 = vsyncadd [#allocation3], 4294966272 }
  0x39   :  { %1632 = dma.done.wait [#allocation6], 2048  }
  0x3a   :  { %1633 = vsyncadd [#allocation6], 4294965248 }
  0x3b   :  { %1634 = dma.done.wait [#allocation9], 2048  }
  0x3c   :  { %1635 = vsyncadd [#allocation9], 4294965248  ;;  %v1470_v0 = vld [vmem:[#allocation5 + $0x38] sm:$0xff]   ;;  %v1471_v1 = vld [vmem:[#allocation5 + $0x30] sm:$0xff]  }
  0x3d   :  { %1268 = vmatprep.subr.bf16.mxu0 %v1470_v0  ;;  %v1472_v2 = vld [vmem:[#allocation5 + $0x28] sm:$0xff]   ;;  %v1473_v3 = vld [vmem:[#allocation5 + $0x20] sm:$0xff]   ;;  %v1474_v5 = vld [vmem:[#allocation5 + $0x18] sm:$0xff]  }
  0x3e   :  { %1269 = vmatpush3.bf16.msra.mxu0 %v1470_v0  ;;  %v1723_v4 = vld [vmem:[#allocation2] sm:$0xff]   ;;  %v1475_v6 = vld [vmem:[#allocation5 + $0x10] sm:$0xff]   ;;  %v1486_v7 = vld [vmem:[#allocation7 + $0x38] sm:$0xff]  }
  0x3f   :  { %1270 = vmatprep.subr.bf16.mxu0 %v1471_v1  ;;  %1284 = vmatprep.mubr.bf16.mxu0 %v1723_v4  ;;  %v1487_v8 = vld [vmem:[#allocation7 + $0x30] sm:$0xff]   ;;  %v1476_v9 = vld [vmem:[#allocation5 + $0x8] sm:$0xff]   ;;  %v1477_v11 = vld [vmem:[#allocation5] sm:$0xff]  }
  0x40   :  { %1300 = vmatprep.subr.bf16.mxu1 %v1486_v7  ;;  %v1488_v10 = vld [vmem:[#allocation7 + $0x28] sm:$0xff]   ;;  %v1489_v12 = vld [vmem:[#allocation7 + $0x20] sm:$0xff]   ;;  %v1490_v13 = vld [vmem:[#allocation7 + $0x18] sm:$0xff]  }
  0x41   :  { %1301 = vmatpush3.bf16.msra.mxu1 %v1486_v7  ;;  %v1726_v14 = vld [vmem:[#allocation2 + $0x8] sm:$0xff]   ;;  %v1728_v15 = vld [vmem:[#allocation2 + $0x10] sm:$0xff]   ;;  %v1732_v17 = vld [vmem:[#allocation2 + $0x18] sm:$0xff]  }
  0x42   :  { %1271 = vmatpush3.bf16.msra.mxu0 %v1471_v1  ;;  %1302 = vmatprep.subr.bf16.mxu1 %v1487_v8  ;;  %v1491_v16 = vld [vmem:[#allocation7 + $0x10] sm:$0xff]   ;;  %v1734_v18 = vld [vmem:[#allocation2 + $0x20] sm:$0xff]   ;;  %v1738_v19 = vld [vmem:[#allocation2 + $0x28] sm:$0xff]  }
  0x43   :  { %1272 = vmatprep.subr.bf16.mxu0 %v1472_v2  ;;  %v1740_v20 = vld [vmem:[#allocation2 + $0x30] sm:$0xff]   ;;  %v1744_v21 = vld [vmem:[#allocation2 + $0x38] sm:$0xff]   ;;  %v1492_v22 = vld [vmem:[#allocation7 + $0x8] sm:$0xff]  }
  0x44   :  { %v1493_v23 = vld [vmem:[#allocation7] sm:$0xff]   ;;  %v1494_v48 = vld [vmem:[#allocation8 + $0x38] sm:$0xff]   ;;  %v1495_v49 = vld [vmem:[#allocation8 + $0x30] sm:$0xff]  }
  0x45   :  { %1303 = vmatpush3.bf16.msra.mxu1 %v1487_v8  ;;  %v1496_v50 = vld [vmem:[#allocation8 + $0x28] sm:$0xff]   ;;  %v1497_v51 = vld [vmem:[#allocation8 + $0x20] sm:$0xff]   ;;  %v1498_v52 = vld [vmem:[#allocation8 + $0x18] sm:$0xff]  }
  0x46   :  { %1273 = vmatpush3.bf16.msra.mxu0 %v1472_v2  ;;  %1304 = vmatprep.subr.bf16.mxu1 %v1488_v10  ;;  %v1499_v53 = vld [vmem:[#allocation8 + $0x10] sm:$0xff]  }
  0x47   :  { %1274 = vmatprep.subr.bf16.mxu0 %v1473_v3 }
  0x49   :  { %1305 = vmatpush3.bf16.msra.mxu1 %v1488_v10 }
  0x4a   :  { %1275 = vmatpush3.bf16.msra.mxu0 %v1473_v3  ;;  %1306 = vmatprep.subr.bf16.mxu1 %v1489_v12  ;;  %v1145_v3 = vld [vmem:[%s1778_s3] ss:$0 sm:$0xff] }
  0x4b   :  { %1276 = vmatprep.subr.bf16.mxu0 %v1474_v5 }
  0x4d   :  { %1307 = vmatpush3.bf16.msra.mxu1 %v1489_v12 }
  0x4e   :  { %1277 = vmatpush3.bf16.msra.mxu0 %v1474_v5  ;;  %1308 = vmatprep.subr.bf16.mxu1 %v1490_v13 }
  0x4f   :  { %1278 = vmatprep.subr.bf16.mxu0 %v1475_v6 }
  0x51   :  { %1309 = vmatpush3.bf16.msra.mxu1 %v1490_v13 }
  0x52   :  { %1279 = vmatpush3.bf16.msra.mxu0 %v1475_v6  ;;  %1310 = vmatprep.subr.bf16.mxu1 %v1491_v16 }
  0x53   :  { %1280 = vmatprep.subr.bf16.mxu0 %v1476_v9 }
  0x55   :  { %1311 = vmatpush3.bf16.msra.mxu1 %v1491_v16 }
  0x56   :  { %1281 = vmatpush3.bf16.msra.mxu0 %v1476_v9  ;;  %1312 = vmatprep.subr.bf16.mxu1 %v1492_v22 }
  0x57   :  { %1282 = vmatprep.subr.bf16.mxu0 %v1477_v11 }
  0x59   :  { %1313 = vmatpush3.bf16.msra.mxu1 %v1492_v22 }
  0x5a   :  { %1283 = vmatpush3.bf16.msra.mxu0 %v1477_v11  ;;  %1314 = vmatprep.subr.bf16.mxu1 %v1493_v23 }
  0x5d   :  { %1285 = vmatmul.mubr.bf16.vlgmr.msra.gmra.mxu0 %v1726_v14  ;;  %1315 = vmatpush3.bf16.msra.mxu1 %v1493_v23 }
  0x5e   :  { %1288 = vmatprep.mubr.bf16.mxu0 %v1728_v15  ;;  %1364 = vmatprep.subr.bf16.mxu1 %v1494_v48 }
  0x65   :  { %1289 = vmatmul.mubr.bf16.gmra.mxu0 %v1732_v17 }
  0x66   :  { %1292 = vmatprep.mubr.bf16.mxu0 %v1734_v18 }
  0x6d   :  { %1293 = vmatmul.mubr.bf16.gmra.mxu0 %v1738_v19 }
  0x6e   :  { %1296 = vmatprep.mubr.bf16.mxu0 %v1740_v20 }
  0x75   :  { %1297 = vmatmul.mubr.bf16.gmra.mxu0 %v1744_v21 }
  0x76   :  { %1348 = vmatprep.mubr.bf16.mxu0 %v1723_v4 }
 0x11d   :  { %v1286_v24 = vpop.f32.mrf.mxu0 }
 0x11f   :  { %v278_v25 = vpop.f32.mrf.mxu0 }
 0x121   :  { %v1287_v26 = vpop.f32.mrf.mxu0 }
 0x122   :  { %v342_v29 = vpack.c.bf16 %v1287_v26, %v1286_v24 }
 0x123   :  { %v281_v27 = vpop.f32.mrf.mxu0 }
 0x124   :  { %v341_v28 = vpack.c.bf16 %v281_v27, %v278_v25 }
 0x125   :  { %v1290_v30 = vpop.f32.mrf.mxu0 }
 0x126   :  { %1316 = vmatprep.mubr.bf16.mxu1 %v341_v28 }
 0x127   :  { %v294_v31 = vpop.f32.mrf.mxu0  ;;  %1317 = vmatmul.mubr.bf16.vlgmr.msra.gmra.mxu1 %v342_v29 }
 0x128   :  { %1365 = vmatpush3.bf16.msra.mxu1 %v1494_v48 }
 0x129   :  { %v1291_v32 = vpop.f32.mrf.mxu0  ;;  %1366 = vmatprep.subr.bf16.mxu1 %v1495_v49 }
 0x12a   :  { %v344_v35 = vpack.c.bf16 %v1291_v32, %v1290_v30 }
 0x12b   :  { %v297_v33 = vpop.f32.mrf.mxu0 }
 0x12c   :  { %v343_v34 = vpack.c.bf16 %v297_v33, %v294_v31  ;;  %1367 = vmatpush3.bf16.msra.mxu1 %v1495_v49 }
 0x12d   :  { %v1294_v36 = vpop.f32.mrf.mxu0  ;;  %1368 = vmatprep.subr.bf16.mxu1 %v1496_v50 }
 0x12e   :  { %1320 = vmatprep.mubr.bf16.mxu1 %v343_v34 }
 0x12f   :  { %v310_v37 = vpop.f32.mrf.mxu0  ;;  %1321 = vmatmul.mubr.bf16.gmra.mxu1 %v344_v35 }
 0x130   :  { %1369 = vmatpush3.bf16.msra.mxu1 %v1496_v50 }
 0x131   :  { %v1295_v38 = vpop.f32.mrf.mxu0  ;;  %1370 = vmatprep.subr.bf16.mxu1 %v1497_v51 }
 0x132   :  { %v346_v41 = vpack.c.bf16 %v1295_v38, %v1294_v36 }
 0x133   :  { %v313_v39 = vpop.f32.mrf.mxu0 }
 0x134   :  { %v345_v40 = vpack.c.bf16 %v313_v39, %v310_v37  ;;  %1371 = vmatpush3.bf16.msra.mxu1 %v1497_v51 }
 0x135   :  { %v1298_v42 = vpop.f32.mrf.mxu0  ;;  %1372 = vmatprep.subr.bf16.mxu1 %v1498_v52 }
 0x136   :  { %1324 = vmatprep.mubr.bf16.mxu1 %v345_v40 }
 0x137   :  { %v326_v43 = vpop.f32.mrf.mxu0  ;;  %1325 = vmatmul.mubr.bf16.gmra.mxu1 %v346_v41 }
 0x138   :  { %1373 = vmatpush3.bf16.msra.mxu1 %v1498_v52 }
 0x139   :  { %v1299_v44 = vpop.f32.mrf.mxu0  ;;  %1374 = vmatprep.subr.bf16.mxu1 %v1499_v53 }
 0x13a   :  { %v348_v47 = vpack.c.bf16 %v1299_v44, %v1298_v42 }
 0x13b   :  { %v329_v45 = vpop.f32.mrf.mxu0 }
 0x13c   :  { %v347_v46 = vpack.c.bf16 %v329_v45, %v326_v43  ;;  %1375 = vmatpush3.bf16.msra.mxu1 %v1499_v53 }
 0x13e   :  { %1328 = vmatprep.mubr.bf16.mxu1 %v347_v46 }
 0x13f   :  { %1329 = vmatmul.mubr.bf16.gmra.mxu1 %v348_v47 }
 0x1e7   :  { %v1318_v54 = vpop.f32.mrf.mxu1 }
 0x1e8   :  { %v446_v44 = vadd.f32 %v1318_v54, %v1145_v3  ;;  %v1500_v54 = vld [vmem:[#allocation8 + $0x8] sm:$0xff]  }
 0x1e9   :  { %v437_v55 = vpop.f32.mrf.mxu1  ;;  %1376 = vmatprep.subr.bf16.mxu1 %v1500_v54 }
 0x1ea   :  { %v502_v49 = vmax.f32 %v446_v44, 0.0  ;;  %v438_v50 = vadd.f32 %v1145_v3, %v437_v55  ;;  %1377 = vmatpush3.bf16.msra.mxu1 %v1500_v54  ;;  %v1501_v55 = vld [vmem:[#allocation8] sm:$0xff]  }
 0x1eb   :  { %v1319_v56 = vpop.f32.mrf.mxu1  ;;  %1378 = vmatprep.subr.bf16.mxu1 %v1501_v55 }
 0x1ec   :  { %v449_v41 = vadd.f32 %v1319_v56, %v1145_v3  ;;  %v500_v53 = vmax.f32 %v438_v50, 0.0 }
 0x1ed   :  { %v440_v57 = vpop.f32.mrf.mxu1 }
 0x1ee   :  { %v503_v46 = vmax.f32 %v449_v41, 0.0  ;;  %v441_v47 = vadd.f32 %v1145_v3, %v440_v57  ;;  %1379 = vmatpush3.bf16.msra.mxu1 %v1501_v55 }
 0x1ef   :  { %v1322_v58 = vpop.f32.mrf.mxu1 }
 0x1f0   :  { %v462_v34 = vadd.f32 %v1322_v58, %v1145_v3  ;;  %v517_v51 = vpack.c.bf16 %v503_v46, %v502_v49  ;;  %v501_v52 = vmax.f32 %v441_v47, 0.0 }
 0x1f1   :  { %v453_v59 = vpop.f32.mrf.mxu1 }
 0x1f2   :  { %v506_v39 = vmax.f32 %v462_v34, 0.0  ;;  %v454_v40 = vadd.f32 %v1145_v3, %v453_v59  ;;  %v516_v58 = vpack.c.bf16 %v501_v52, %v500_v53 }
 0x1f3   :  { %v1323_v60 = vpop.f32.mrf.mxu1 }
 0x1f4   :  { %v465_v31 = vadd.f32 %v1323_v60, %v1145_v3  ;;  %v504_v45 = vmax.f32 %v454_v40, 0.0 }
 0x1f5   :  { %v456_v61 = vpop.f32.mrf.mxu1 }
 0x1f6   :  { %v507_v36 = vmax.f32 %v465_v31, 0.0  ;;  %v457_v37 = vadd.f32 %v1145_v3, %v456_v61 }
 0x1f7   :  { %v1326_v62 = vpop.f32.mrf.mxu1 }
 0x1f8   :  { %v478_v22 = vadd.f32 %v1326_v62, %v1145_v3  ;;  %v519_v42 = vpack.c.bf16 %v507_v36, %v506_v39  ;;  %v505_v43 = vmax.f32 %v457_v37, 0.0 }
 0x1f9   :  { %v469_v63 = vpop.f32.mrf.mxu1 }
 0x1fa   :  { %v510_v29 = vmax.f32 %v478_v22, 0.0  ;;  %v470_v30 = vadd.f32 %v1145_v3, %v469_v63  ;;  %v518_v48 = vpack.c.bf16 %v505_v43, %v504_v45  ;;  %v1154_v43 = vld [vmem:[%s1780_s5] ss:$0 sm:$0xff] }
 0x1fb   :  { %v1327_v0 = vpop.f32.mrf.mxu1 }
 0x1fc   :  { %v481_v11 = vadd.f32 %v1327_v0, %v1145_v3  ;;  %v508_v35 = vmax.f32 %v470_v30, 0.0 }
 0x1fd   :  { %v472_v1 = vpop.f32.mrf.mxu1 }
 0x1fe   :  { %v511_v26 = vmax.f32 %v481_v11, 0.0  ;;  %v473_v27 = vadd.f32 %v1145_v3, %v472_v1 }
 0x1ff   :  { %v1330_v2 = vpop.f32.mrf.mxu1 }
 0x200   :  { %v494_v6 = vadd.f32 %v1330_v2, %v1145_v3  ;;  %v521_v32 = vpack.c.bf16 %v511_v26, %v510_v29  ;;  %v509_v33 = vmax.f32 %v473_v27, 0.0  ;;  %v1504_v26 = vld [vmem:[#allocation10 + $0x28] sm:$0xff]   ;;  %v1505_v27 = vld [vmem:[#allocation10 + $0x20] sm:$0xff]   ;;  %v1507_v29 = vld [vmem:[#allocation10 + $0x10] sm:$0xff]  }
 0x201   :  { %v485_v5 = vpop.f32.mrf.mxu1 }
 0x202   :  { %v486_v8 = vadd.f32 %v1145_v3, %v485_v5  ;;  %v514_v12 = vmax.f32 %v494_v6, 0.0  ;;  %v520_v38 = vpack.c.bf16 %v509_v33, %v508_v35 }
 0x203   :  { %v1331_v7 = vpop.f32.mrf.mxu1 }
 0x204   :  { %v497_v9 = vadd.f32 %v1331_v7, %v1145_v3  ;;  %v512_v23 = vmax.f32 %v486_v8, 0.0 }
 0x205   :  { %v488_v10 = vpop.f32.mrf.mxu1 }
 0x206   :  { %v515_v13 = vmax.f32 %v497_v9, 0.0  ;;  %v489_v16 = vadd.f32 %v1145_v3, %v488_v10 }
 0x208   :  { %v523_v24 = vpack.c.bf16 %v515_v13, %v514_v12  ;;  %v513_v25 = vmax.f32 %v489_v16, 0.0 }
 0x20a   :  { %v522_v28 = vpack.c.bf16 %v513_v25, %v512_v23  ;;  %1332 = vmatprep.subr.bf16.mxu0 %v523_v24  ;;  %v1503_v25 = vld [vmem:[#allocation10 + $0x30] sm:$0xff]  }
 0x20b   :  { %1333 = vmatpush3.bf16.msra.mxu0 %v523_v24  ;;  %v1502_v24 = vld [vmem:[#allocation10 + $0x38] sm:$0xff]  }
 0x20c   :  { %1334 = vmatprep.subr.bf16.mxu0 %v522_v28  ;;  %1428 = vmatprep.subr.bf16.mxu1 %v1502_v24 }
 0x20f   :  { %1335 = vmatpush3.bf16.msra.mxu0 %v522_v28  ;;  %v1506_v28 = vld [vmem:[#allocation10 + $0x18] sm:$0xff]  }
 0x210   :  { %1336 = vmatprep.subr.bf16.mxu0 %v521_v32 }
 0x213   :  { %1337 = vmatpush3.bf16.msra.mxu0 %v521_v32 }
 0x214   :  { %1338 = vmatprep.subr.bf16.mxu0 %v520_v38 }
 0x217   :  { %1339 = vmatpush3.bf16.msra.mxu0 %v520_v38 }
 0x218   :  { %1340 = vmatprep.subr.bf16.mxu0 %v519_v42 }
 0x21b   :  { %1341 = vmatpush3.bf16.msra.mxu0 %v519_v42 }
 0x21c   :  { %1342 = vmatprep.subr.bf16.mxu0 %v518_v48 }
 0x21f   :  { %1343 = vmatpush3.bf16.msra.mxu0 %v518_v48 }
 0x220   :  { %1344 = vmatprep.subr.bf16.mxu0 %v517_v51 }
 0x223   :  { %1345 = vmatpush3.bf16.msra.mxu0 %v517_v51 }
 0x224   :  { %1346 = vmatprep.subr.bf16.mxu0 %v516_v58 }
 0x227   :  { %1347 = vmatpush3.bf16.msra.mxu0 %v516_v58 }
 0x22a   :  { %1349 = vmatmul.mubr.bf16.vlgmr.msra.gmra.mxu0 %v1726_v14 }
 0x22b   :  { %1352 = vmatprep.mubr.bf16.mxu0 %v1728_v15 }
 0x232   :  { %1353 = vmatmul.mubr.bf16.gmra.mxu0 %v1732_v17 }
 0x233   :  { %1356 = vmatprep.mubr.bf16.mxu0 %v1734_v18 }
 0x23a   :  { %1357 = vmatmul.mubr.bf16.gmra.mxu0 %v1738_v19 }
 0x23b   :  { %1360 = vmatprep.mubr.bf16.mxu0 %v1740_v20 }
 0x242   :  { %1361 = vmatmul.mubr.bf16.gmra.mxu0 %v1744_v21 }
 0x243   :  { %1412 = vmatprep.mubr.bf16.mxu0 %v1723_v4 }
 0x2ea   :  { %v1350_v56 = vpop.f32.mrf.mxu0 }
 0x2ec   :  { %v575_v57 = vpop.f32.mrf.mxu0 }
 0x2ee   :  { %v1351_v59 = vpop.f32.mrf.mxu0 }
 0x2ef   :  { %v639_v62 = vpack.c.bf16 %v1351_v59, %v1350_v56 }
 0x2f0   :  { %v578_v60 = vpop.f32.mrf.mxu0 }
 0x2f1   :  { %v638_v61 = vpack.c.bf16 %v578_v60, %v575_v57 }
 0x2f2   :  { %v1354_v63 = vpop.f32.mrf.mxu0 }
 0x2f3   :  { %1380 = vmatprep.mubr.bf16.mxu1 %v638_v61 }
 0x2f4   :  { %v591_v0 = vpop.f32.mrf.mxu0  ;;  %1381 = vmatmul.mubr.bf16.vlgmr.msra.gmra.mxu1 %v639_v62 }
 0x2f5   :  { %1429 = vmatpush3.bf16.msra.mxu1 %v1502_v24 }
 0x2f6   :  { %v1355_v1 = vpop.f32.mrf.mxu0  ;;  %1430 = vmatprep.subr.bf16.mxu1 %v1503_v25 }
 0x2f7   :  { %v641_v4 = vpack.c.bf16 %v1355_v1, %v1354_v63 }
 0x2f8   :  { %v594_v2 = vpop.f32.mrf.mxu0 }
 0x2f9   :  { %v640_v3 = vpack.c.bf16 %v594_v2, %v591_v0  ;;  %1431 = vmatpush3.bf16.msra.mxu1 %v1503_v25 }
 0x2fa   :  { %v1358_v5 = vpop.f32.mrf.mxu0  ;;  %1432 = vmatprep.subr.bf16.mxu1 %v1504_v26 }
 0x2fb   :  { %1384 = vmatprep.mubr.bf16.mxu1 %v640_v3 }
 0x2fc   :  { %v607_v6 = vpop.f32.mrf.mxu0  ;;  %1385 = vmatmul.mubr.bf16.gmra.mxu1 %v641_v4 }
 0x2fd   :  { %1433 = vmatpush3.bf16.msra.mxu1 %v1504_v26 }
 0x2fe   :  { %v1359_v7 = vpop.f32.mrf.mxu0  ;;  %1434 = vmatprep.subr.bf16.mxu1 %v1505_v27 }
 0x2ff   :  { %v643_v10 = vpack.c.bf16 %v1359_v7, %v1358_v5 }
 0x300   :  { %v610_v8 = vpop.f32.mrf.mxu0 }
 0x301   :  { %v642_v9 = vpack.c.bf16 %v610_v8, %v607_v6  ;;  %1435 = vmatpush3.bf16.msra.mxu1 %v1505_v27 }
 0x302   :  { %v1362_v11 = vpop.f32.mrf.mxu0  ;;  %1436 = vmatprep.subr.bf16.mxu1 %v1506_v28 }
 0x303   :  { %1388 = vmatprep.mubr.bf16.mxu1 %v642_v9 }
 0x304   :  { %v623_v12 = vpop.f32.mrf.mxu0  ;;  %1389 = vmatmul.mubr.bf16.gmra.mxu1 %v643_v10 }
 0x305   :  { %1437 = vmatpush3.bf16.msra.mxu1 %v1506_v28 }
 0x306   :  { %v1363_v13 = vpop.f32.mrf.mxu0  ;;  %1438 = vmatprep.subr.bf16.mxu1 %v1507_v29 }
 0x307   :  { %v645_v23 = vpack.c.bf16 %v1363_v13, %v1362_v11 }
 0x308   :  { %v626_v16 = vpop.f32.mrf.mxu0 }
 0x309   :  { %v644_v22 = vpack.c.bf16 %v626_v16, %v623_v12  ;;  %1439 = vmatpush3.bf16.msra.mxu1 %v1507_v29 }
 0x30b   :  { %1392 = vmatprep.mubr.bf16.mxu1 %v644_v22 }
 0x30c   :  { %1393 = vmatmul.mubr.bf16.gmra.mxu1 %v645_v23 }
 0x3b4   :  { %v1382_v30 = vpop.f32.mrf.mxu1 }
 0x3b5   :  { %v743_v12 = vadd.f32 %v1382_v30, %v1154_v43  ;;  %v1508_v30 = vld [vmem:[#allocation10 + $0x8] sm:$0xff]  }
 0x3b6   :  { %v734_v31 = vpop.f32.mrf.mxu1  ;;  %1440 = vmatprep.subr.bf16.mxu1 %v1508_v30 }
 0x3b7   :  { %v799_v24 = vmax.f32 %v743_v12, 0.0  ;;  %v735_v25 = vadd.f32 %v1154_v43, %v734_v31  ;;  %1441 = vmatpush3.bf16.msra.mxu1 %v1508_v30  ;;  %v1509_v31 = vld [vmem:[#allocation10] sm:$0xff]  }
 0x3b8   :  { %v1383_v32 = vpop.f32.mrf.mxu1  ;;  %1442 = vmatprep.subr.bf16.mxu1 %v1509_v31 }
 0x3b9   :  { %v746_v9 = vadd.f32 %v1383_v32, %v1154_v43  ;;  %v797_v28 = vmax.f32 %v735_v25, 0.0 }
 0x3ba   :  { %v737_v33 = vpop.f32.mrf.mxu1 }
 0x3bb   :  { %v800_v16 = vmax.f32 %v746_v9, 0.0  ;;  %v738_v22 = vadd.f32 %v1154_v43, %v737_v33  ;;  %1443 = vmatpush3.bf16.msra.mxu1 %v1509_v31 }
 0x3bc   :  { %v1386_v34 = vpop.f32.mrf.mxu1 }
 0x3bd   :  { %v759_v2 = vadd.f32 %v1386_v34, %v1154_v43  ;;  %v814_v26 = vpack.c.bf16 %v800_v16, %v799_v24  ;;  %v798_v27 = vmax.f32 %v738_v22, 0.0 }
 0x3be   :  { %v750_v35 = vpop.f32.mrf.mxu1 }
 0x3bf   :  { %v803_v7 = vmax.f32 %v759_v2, 0.0  ;;  %v751_v8 = vadd.f32 %v1154_v43, %v750_v35  ;;  %v813_v29 = vpack.c.bf16 %v798_v27, %v797_v28 }
 0x3c0   :  { %v1387_v36 = vpop.f32.mrf.mxu1 }
 0x3c1   :  { %v762_v63 = vadd.f32 %v1387_v36, %v1154_v43  ;;  %v801_v13 = vmax.f32 %v751_v8, 0.0 }
 0x3c2   :  { %v753_v37 = vpop.f32.mrf.mxu1 }
 0x3c3   :  { %v804_v4 = vmax.f32 %v762_v63, 0.0  ;;  %v754_v5 = vadd.f32 %v1154_v43, %v753_v37 }
 0x3c4   :  { %v1390_v38 = vpop.f32.mrf.mxu1 }
 0x3c5   :  { %v775_v58 = vadd.f32 %v1390_v38, %v1154_v43  ;;  %v816_v10 = vpack.c.bf16 %v804_v4, %v803_v7  ;;  %v802_v11 = vmax.f32 %v754_v5, 0.0 }
 0x3c6   :  { %v766_v39 = vpop.f32.mrf.mxu1 }
 0x3c7   :  { %v807_v61 = vmax.f32 %v775_v58, 0.0  ;;  %v767_v62 = vadd.f32 %v1154_v43, %v766_v39  ;;  %v815_v23 = vpack.c.bf16 %v802_v11, %v801_v13 }
 0x3c8   :  { %v1391_v40 = vpop.f32.mrf.mxu1 }
 0x3c9   :  { %v778_v50 = vadd.f32 %v1391_v40, %v1154_v43  ;;  %v805_v3 = vmax.f32 %v767_v62, 0.0 }
 0x3ca   :  { %v769_v41 = vpop.f32.mrf.mxu1 }
 0x3cb   :  { %v808_v57 = vmax.f32 %v778_v50, 0.0  ;;  %v770_v59 = vadd.f32 %v1154_v43, %v769_v41 }
 0x3cc   :  { %v1394_v42 = vpop.f32.mrf.mxu1 }
 0x3cd   :  { %v791_v45 = vadd.f32 %v1394_v42, %v1154_v43  ;;  %v818_v0 = vpack.c.bf16 %v808_v57, %v807_v61  ;;  %v806_v1 = vmax.f32 %v770_v59, 0.0 }
 0x3ce   :  { %v782_v44 = vpop.f32.mrf.mxu1 }
 0x3cf   :  { %v783_v47 = vadd.f32 %v1154_v43, %v782_v44  ;;  %v811_v51 = vmax.f32 %v791_v45, 0.0  ;;  %v817_v6 = vpack.c.bf16 %v806_v1, %v805_v3 }
 0x3d0   :  { %v1395_v46 = vpop.f32.mrf.mxu1 }
 0x3d1   :  { %v794_v48 = vadd.f32 %v1395_v46, %v1154_v43  ;;  %v809_v54 = vmax.f32 %v783_v47, 0.0 }
 0x3d2   :  { %v785_v49 = vpop.f32.mrf.mxu1 }
 0x3d3   :  { %v812_v52 = vmax.f32 %v794_v48, 0.0  ;;  %v786_v53 = vadd.f32 %v1154_v43, %v785_v49  ;;  %v1163_v49 = vld [vmem:[%s1782_s7] ss:$0 sm:$0xff]  ;;  %s1645_s7 = smov [#allocation11]  }
 0x3d4   :  { %s1115_s9 = sshll.u32 %s1645_s7, 4  ;;  %s1116_s9 = int_to_ptr.vmem [resolvable:$true] %s1115_s9 }
 0x3d5   :  { %v820_v55 = vpack.c.bf16 %v812_v52, %v811_v51  ;;  %v810_v56 = vmax.f32 %v786_v53, 0.0  ;;  %s1610_s10 = scalar_lea.vmem %s1116_s9, 2048  ;;  %p1615_p12 = scmp.lt.s32.totalorder %s1116_s9, %s1116_s9 }
 0x3d6   :  { %p1611_p11 = scmp.ne.s32.totalorder %s1116_s9, %s1610_s10  ;;  %p1616_p13 = scmp.lt.s32.totalorder %s1610_s10, %s1610_s10 }
 0x3d7   :  { %v819_v60 = vpack.c.bf16 %v810_v56, %v809_v54  ;;  %1396 = vmatprep.subr.bf16.mxu0 %v820_v55 }
 0x3d8   :  { %1397 = vmatpush3.bf16.msra.mxu0 %v820_v55  ;;  %p1617_p0 = por %p1616_p13, %p1615_p12 }
 0x3d9   :  { %1398 = vmatprep.subr.bf16.mxu0 %v819_v60 }
 0x3da   :  { %p1618_p1 = pnand %p1617_p0, %p1611_p11 }
 0x3dc   :  { %1399 = vmatpush3.bf16.msra.mxu0 %v819_v60 }
 0x3dd   :  { %1400 = vmatprep.subr.bf16.mxu0 %v818_v0 }
 0x3e0   :  { %1401 = vmatpush3.bf16.msra.mxu0 %v818_v0 }
 0x3e1   :  { %1402 = vmatprep.subr.bf16.mxu0 %v817_v6 }
 0x3e4   :  { %1403 = vmatpush3.bf16.msra.mxu0 %v817_v6 }
 0x3e5   :  { %1404 = vmatprep.subr.bf16.mxu0 %v816_v10 }
 0x3e8   :  { %1405 = vmatpush3.bf16.msra.mxu0 %v816_v10 }
 0x3e9   :  { %1406 = vmatprep.subr.bf16.mxu0 %v815_v23 }
 0x3ec   :  { %1407 = vmatpush3.bf16.msra.mxu0 %v815_v23 }
 0x3ed   :  { %1408 = vmatprep.subr.bf16.mxu0 %v814_v26 }
 0x3f0   :  { %1409 = vmatpush3.bf16.msra.mxu0 %v814_v26 }
 0x3f1   :  { %1410 = vmatprep.subr.bf16.mxu0 %v813_v29 }
 0x3f4   :  { %1411 = vmatpush3.bf16.msra.mxu0 %v813_v29 }
 0x3f7   :  { %1413 = vmatmul.mubr.bf16.vlgmr.msra.gmra.mxu0 %v1726_v14 }
 0x3f8   :  { %1416 = vmatprep.mubr.bf16.mxu0 %v1728_v15 }
 0x3ff   :  { %1417 = vmatmul.mubr.bf16.gmra.mxu0 %v1732_v17 }
 0x400   :  { %1420 = vmatprep.mubr.bf16.mxu0 %v1734_v18 }
 0x407   :  { %1421 = vmatmul.mubr.bf16.gmra.mxu0 %v1738_v19 }
 0x408   :  { %1424 = vmatprep.mubr.bf16.mxu0 %v1740_v20 }
 0x40f   :  { %1425 = vmatmul.mubr.bf16.gmra.mxu0 %v1744_v21 }
 0x4b7   :  { %v1414_v32 = vpop.f32.mrf.mxu0 }
 0x4b9   :  { %v872_v14 = vpop.f32.mrf.mxu0 }
 0x4bb   :  { %v1415_v33 = vpop.f32.mrf.mxu0 }
 0x4bc   :  { %v936_v17 = vpack.c.bf16 %v1415_v33, %v1414_v32 }
 0x4bd   :  { %v875_v15 = vpop.f32.mrf.mxu0 }
 0x4be   :  { %v935_v34 = vpack.c.bf16 %v875_v15, %v872_v14 }
 0x4bf   :  { %v1418_v35 = vpop.f32.mrf.mxu0 }
 0x4c0   :  { %1444 = vmatprep.mubr.bf16.mxu1 %v935_v34 }
 0x4c1   :  { %v888_v18 = vpop.f32.mrf.mxu0  ;;  %1445 = vmatmul.mubr.bf16.vlgmr.msra.gmra.mxu1 %v936_v17 }
 0x4c3   :  { %v1419_v19 = vpop.f32.mrf.mxu0 }
 0x4c4   :  { %v938_v21 = vpack.c.bf16 %v1419_v19, %v1418_v35 }
 0x4c5   :  { %v891_v20 = vpop.f32.mrf.mxu0 }
 0x4c6   :  { %v937_v36 = vpack.c.bf16 %v891_v20, %v888_v18 }
 0x4c7   :  { %v1422_v37 = vpop.f32.mrf.mxu0 }
 0x4c8   :  { %1448 = vmatprep.mubr.bf16.mxu1 %v937_v36 }
 0x4c9   :  { %v904_v38 = vpop.f32.mrf.mxu0  ;;  %1449 = vmatmul.mubr.bf16.gmra.mxu1 %v938_v21 }
 0x4cb   :  { %v1423_v39 = vpop.f32.mrf.mxu0 }
 0x4cc   :  { %v940_v42 = vpack.c.bf16 %v1423_v39, %v1422_v37 }
 0x4cd   :  { %v907_v40 = vpop.f32.mrf.mxu0 }
 0x4ce   :  { %v939_v41 = vpack.c.bf16 %v907_v40, %v904_v38 }
 0x4cf   :  { %v1426_v43 = vpop.f32.mrf.mxu0 }
 0x4d0   :  { %1452 = vmatprep.mubr.bf16.mxu1 %v939_v41 }
 0x4d1   :  { %v920_v44 = vpop.f32.mrf.mxu0  ;;  %1453 = vmatmul.mubr.bf16.gmra.mxu1 %v940_v42 }
 0x4d3   :  { %v1427_v45 = vpop.f32.mrf.mxu0 }
 0x4d4   :  { %v942_v48 = vpack.c.bf16 %v1427_v45, %v1426_v43 }
 0x4d5   :  { %v923_v46 = vpop.f32.mrf.mxu0 }
 0x4d6   :  { %v941_v47 = vpack.c.bf16 %v923_v46, %v920_v44 }
 0x4d8   :  { %1456 = vmatprep.mubr.bf16.mxu1 %v941_v47 }
 0x4d9   :  { %1457 = vmatmul.mubr.bf16.gmra.mxu1 %v942_v48 }
 0x581   :  { %v1446_v50 = vpop.f32.mrf.mxu1 }
 0x582   :  { %v1040_v51 = vadd.f32 %v1446_v50, %v1163_v49 }
 0x583   :  { %v1031_v52 = vpop.f32.mrf.mxu1 }
 0x584   :  { %1096 = vst [vmem:[#allocation11 + $0x10] sm:$0xff] %v1040_v51  ;;  %v1032_v53 = vadd.f32 %v1163_v49, %v1031_v52 }
 0x585   :  { %v1447_v58 = vpop.f32.mrf.mxu1 }
 0x586   :  { %1094 = vst [vmem:[#allocation11] sm:$0xff] %v1032_v53  ;;  %v1043_v54 = vadd.f32 %v1447_v58, %v1163_v49 }
 0x587   :  { %v1034_v55 = vpop.f32.mrf.mxu1 }
 0x588   :  { %1097 = vst [vmem:[#allocation11 + $0x18] sm:$0xff] %v1043_v54  ;;  %v1035_v56 = vadd.f32 %v1163_v49, %v1034_v55 }
 0x589   :  { %v1450_v57 = vpop.f32.mrf.mxu1 }
 0x58a   :  { %1095 = vst [vmem:[#allocation11 + $0x8] sm:$0xff] %v1035_v56  ;;  %v1056_v59 = vadd.f32 %v1450_v57, %v1163_v49 }
 0x58b   :  { %v1047_v60 = vpop.f32.mrf.mxu1 }
 0x58c   :  { %1100 = vst [vmem:[#allocation11 + $0x30] sm:$0xff] %v1056_v59  ;;  %v1048_v61 = vadd.f32 %v1163_v49, %v1047_v60 }
 0x58d   :  { %v1451_v62 = vpop.f32.mrf.mxu1 }
 0x58e   :  { %1098 = vst [vmem:[#allocation11 + $0x20] sm:$0xff] %v1048_v61  ;;  %v1059_v63 = vadd.f32 %v1451_v62, %v1163_v49 }
 0x58f   :  { %v1050_v0 = vpop.f32.mrf.mxu1 }
 0x590   :  { %1101 = vst [vmem:[#allocation11 + $0x38] sm:$0xff] %v1059_v63  ;;  %v1051_v1 = vadd.f32 %v1163_v49, %v1050_v0 }
 0x591   :  { %v1454_v2 = vpop.f32.mrf.mxu1 }
 0x592   :  { %1099 = vst [vmem:[#allocation11 + $0x28] sm:$0xff] %v1051_v1  ;;  %v1072_v3 = vadd.f32 %v1454_v2, %v1163_v49 }
 0x593   :  { %v1063_v4 = vpop.f32.mrf.mxu1 }
 0x594   :  { %1104 = vst [vmem:[#allocation11 + $0x50] sm:$0xff] %v1072_v3  ;;  %v1064_v5 = vadd.f32 %v1163_v49, %v1063_v4 }
 0x595   :  { %v1455_v6 = vpop.f32.mrf.mxu1 }
 0x596   :  { %1102 = vst [vmem:[#allocation11 + $0x40] sm:$0xff] %v1064_v5  ;;  %v1075_v7 = vadd.f32 %v1455_v6, %v1163_v49 }
 0x597   :  { %v1066_v8 = vpop.f32.mrf.mxu1 }
 0x598   :  { %1105 = vst [vmem:[#allocation11 + $0x58] sm:$0xff] %v1075_v7  ;;  %v1067_v9 = vadd.f32 %v1163_v49, %v1066_v8 }
 0x599   :  { %v1458_v10 = vpop.f32.mrf.mxu1 }
 0x59a   :  { %1103 = vst [vmem:[#allocation11 + $0x48] sm:$0xff] %v1067_v9  ;;  %v1088_v11 = vadd.f32 %v1458_v10, %v1163_v49 }
 0x59b   :  { %v1079_v12 = vpop.f32.mrf.mxu1 }
 0x59c   :  { %1108 = vst [vmem:[#allocation11 + $0x70] sm:$0xff] %v1088_v11  ;;  %v1080_v13 = vadd.f32 %v1163_v49, %v1079_v12 }
 0x59d   :  { %v1459_v16 = vpop.f32.mrf.mxu1 }
 0x59e   :  { %1106 = vst [vmem:[#allocation11 + $0x60] sm:$0xff] %v1080_v13  ;;  %v1091_v22 = vadd.f32 %v1459_v16, %v1163_v49 }
 0x59f   :  { %v1082_v23 = vpop.f32.mrf.mxu1 }
 0x5a0   :  { %1109 = vst [vmem:[#allocation11 + $0x78] sm:$0xff] %v1091_v22  ;;  %v1083_v24 = vadd.f32 %v1163_v49, %v1082_v23 }
 0x5a2   :  { %1107 = vst [vmem:[#allocation11 + $0x68] sm:$0xff] %v1083_v24 }
 0x5a3   :  { %1621 = shalt.err (!%p1618_p1)
}
 0x5a4   :  { %s1646_s11 = smov 128   ;;  %s1647_s12 = smov 8  }
 0x5a5   :  { %1121 = dma.vmem_to_hbm [thread:$0]  %s1116_s9, 2048, %s1783_s8, [#allocation4], %s1646_s11, %s1646_s11, %s1647_s12  }
 0x5a6   :  { %1636 = dma.done.wait [#allocation4], 2048  }
 0x5a7   :  { %1637 = vsyncadd [#allocation4], 4294965248 }
 0x5a8   :  { %1125 = vsyncpa [#allocation3], 1 }
 0x5a9   :  { %1126 = vsyncpa [#allocation6], 1 }
 0x5aa   :  { %1127 = vsyncpa [#allocation9], 1 }
 0x5ab   :  { %1128 = vsyncpa [#allocation4], 1 }

</bundles_post_ra>
